<compile_context>
chip_gen: v6e
topology: v6e:2x2x1
jax: 0.10.0
libtpu: 0.0.40
codegen_flags: <defaults>
</compile_context>

<pallas_src>
import functools

import jax
import jax.numpy as jnp
from jax import lax
from jax.experimental import pallas as pl
from jax.experimental.pallas import tpu as pltpu

CONDS_RNC = 6
TARGETS_RNC = 4
IN_FEATS = TARGETS_RNC + CONDS_RNC   # 10
HIDDEN = 128


def _round_up(n, m):
    return ((n + m - 1) // m) * m


def _disc_kernel(x_ref, w1_ref, b1_ref, w2_ref, b2_ref,
                 w3_ref, b3_ref, w4t_ref, b4_ref, o_ref):
    """One batch tile of the MLP forward. x tile: (TB, 10); out tile: (1, TB)."""
    x = x_ref[...]

    def leaky_relu(h):
        return jnp.where(h > 0, h, 0.2 * h)

    # Linear(10,128) + LeakyReLU   (Dropout(0.3) == identity at inference)
    h = leaky_relu(
        jnp.dot(x, w1_ref[...], preferred_element_type=jnp.float32) + b1_ref[...])
    # Linear(128,128) + LeakyReLU  (Dropout == identity)
    h = leaky_relu(
        jnp.dot(h, w2_ref[...], preferred_element_type=jnp.float32) + b2_ref[...])
    # Linear(128,128)
    h = jnp.dot(h, w3_ref[...], preferred_element_type=jnp.float32) + b3_ref[...]
    # Linear(128,1): contract the feature axes of w4^T (1,128) and h (TB,128)
    # -> lane-dense (1, TB) logits (batch rides the lane axis). MXU matmul with
    # a transposed RHS, no explicit XLU transpose emitted.
    logits = lax.dot_general(
        w4t_ref[...], h, (((1,), (1,)), ((), ())),
        preferred_element_type=jnp.float32) + b4_ref[...]
    # Sigmoid (exact reciprocal keeps the 1e-5 numerical check vs jax.nn.sigmoid).
    o_ref[...] = pl.reciprocal(1.0 + jnp.exp(-logits))


def prepare_params(params):
    """One-time weight layout prep (hoisted out of the per-call forward)."""
    (w1, b1), (w2, b2), (w3, b3), (w4, b4) = params
    return (
        w1.astype(jnp.float32),                         # (10, 128)
        b1.reshape(1, HIDDEN).astype(jnp.float32),
        w2.astype(jnp.float32),                         # (128, 128)
        b2.reshape(1, HIDDEN).astype(jnp.float32),
        w3.astype(jnp.float32),                         # (128, 128)
        b3.reshape(1, HIDDEN).astype(jnp.float32),
        w4.reshape(HIDDEN, 1).T.astype(jnp.float32),    # (1, 128)  == w4^T
        b4.reshape(1, 1).astype(jnp.float32),           # (1, 1)
    )


@functools.partial(jax.jit, static_argnames=("block_rows",))
def discriminator_rnc_forward(x, prepared, block_rows=1024):
    """x: (B, 10) float32. Returns (B, 1) float32."""
    w1, b1, w2, b2, w3, b3, w4t, b4 = prepared
    B = x.shape[0]

    # Batch tile: multiple of 128 lanes (output rides the lane axis), capped by
    # block_rows. x+out double-buffers stay tiny (~44 B/row), so this fits the
    # default scoped VMEM on v5e (16 MiB), v6e (32 MiB) and v7x (32 MiB).
    TB = min(block_rows, _round_up(max(B, 1), 128))
    B_pad = _round_up(B, TB)
    if B_pad != B:
        x = jnp.zeros((B_pad, IN_FEATS), x.dtype).at[:B].set(x)
    num_tiles = B_pad // TB

    const = lambda shape: pl.BlockSpec(shape, lambda i: (0, 0))

    out = pl.pallas_call(
        _disc_kernel,
        out_shape=jax.ShapeDtypeStruct((1, B_pad), jnp.float32),
        grid=(num_tiles,),
        in_specs=[
            pl.BlockSpec((TB, IN_FEATS), lambda i: (i, 0)),   # x streamed over batch
            const((IN_FEATS, HIDDEN)), const((1, HIDDEN)),    # w1, b1 (VMEM-resident)
            const((HIDDEN, HIDDEN)), const((1, HIDDEN)),      # w2, b2
            const((HIDDEN, HIDDEN)), const((1, HIDDEN)),      # w3, b3
            const((1, HIDDEN)), const((1, 1)),                # w4^T, b4
        ],
        out_specs=pl.BlockSpec((1, TB), lambda i: (0, i)),    # lane-dense output
        compiler_params=pltpu.CompilerParams(
            dimension_semantics=("parallel",)),
    )(x, w1, b1, w2, b2, w3, b3, w4t, b4)

    return out[0, :B].reshape(B, 1)


def init_params(key):
    """Deterministic init mimicking PyTorch Linear default (U[-1/sqrt(fan_in), +])."""
    dims = [(IN_FEATS, HIDDEN), (HIDDEN, HIDDEN), (HIDDEN, HIDDEN), (HIDDEN, 1)]
    params = []
    for (fan_in, fan_out) in dims:
        key, kw, kb = jax.random.split(key, 3)
        bound = 1.0 / jnp.sqrt(fan_in)
        w = jax.random.uniform(kw, (fan_in, fan_out), jnp.float32, -bound, bound)
        b = jax.random.uniform(kb, (fan_out,), jnp.float32, -bound, bound)
        params.append((w, b))
    return params


def reference_forward(x, params):
    (w1, b1), (w2, b2), (w3, b3), (w4, b4) = params
    lrelu = lambda h: jnp.where(h > 0, h, 0.2 * h)
    h = lrelu(x @ w1 + b1)
    h = lrelu(h @ w2 + b2)
    h = h @ w3 + b3
    h = h @ w4 + b4
    return jax.nn.sigmoid(h)


if __name__ == "__main__":
    key = jax.random.PRNGKey(0)
    kx, kp = jax.random.split(key)

    B = 8
    x = jax.random.normal(kx, (B, IN_FEATS), jnp.float32)
    params = init_params(kp)
    prepared = prepare_params(params)

    out = discriminator_rnc_forward(x, prepared)
    out = jax.block_until_ready(out)

    ref = reference_forward(x, params)
    assert out.shape == (B, 1)
    assert jnp.allclose(out, ref, atol=1e-5, rtol=1e-5), \
        float(jnp.max(jnp.abs(out - ref)))

    print("KERNEL_OK")
</pallas_src>

<mosaic_0001>
module attributes {stable_mosaic.version = 11 : i64} {
  func.func @_disc_kernel(%arg0: i32, %arg1: memref<128x10xf32, #tpu.memory_space<vmem>>, %arg2: memref<10x128xf32, #tpu.memory_space<vmem>>, %arg3: memref<1x128xf32, #tpu.memory_space<vmem>>, %arg4: memref<128x128xf32, #tpu.memory_space<vmem>>, %arg5: memref<1x128xf32, #tpu.memory_space<vmem>>, %arg6: memref<128x128xf32, #tpu.memory_space<vmem>>, %arg7: memref<1x128xf32, #tpu.memory_space<vmem>>, %arg8: memref<1x128xf32, #tpu.memory_space<vmem>>, %arg9: memref<1x1xf32, #tpu.memory_space<vmem>>, %arg10: memref<1x128xf32, #tpu.memory_space<vmem>>) attributes {dimension_semantics = [#tpu.dimension_semantics<parallel>], iteration_bounds = array<i64: 1>, scalar_prefetch = 0 : i64, scratch_operands = 0 : i64, tpu.core_type = #tpu.core_type<tc>, window_params = [{transform_indices = @transform_0, window_bounds = array<i64: 128, 10>}, {pipeline_mode = #tpu.pipeline_mode<synchronous>, transform_indices = @transform_1, window_bounds = array<i64: 10, 128>}, {pipeline_mode = #tpu.pipeline_mode<synchronous>, transform_indices = @transform_2, window_bounds = array<i64: 1, 128>}, {pipeline_mode = #tpu.pipeline_mode<synchronous>, transform_indices = @transform_3, window_bounds = array<i64: 128, 128>}, {pipeline_mode = #tpu.pipeline_mode<synchronous>, transform_indices = @transform_4, window_bounds = array<i64: 1, 128>}, {pipeline_mode = #tpu.pipeline_mode<synchronous>, transform_indices = @transform_5, window_bounds = array<i64: 128, 128>}, {pipeline_mode = #tpu.pipeline_mode<synchronous>, transform_indices = @transform_6, window_bounds = array<i64: 1, 128>}, {pipeline_mode = #tpu.pipeline_mode<synchronous>, transform_indices = @transform_7, window_bounds = array<i64: 1, 128>}, {pipeline_mode = #tpu.pipeline_mode<synchronous>, transform_indices = @transform_8, window_bounds = array<i64: 1, 1>}, {transform_indices = @transform_9, window_bounds = array<i64: 1, 128>}]} {
    %c0 = arith.constant 0 : index
    %c0_0 = arith.constant 0 : index
    %0 = vector.load %arg1[%c0, %c0_0] : memref<128x10xf32, #tpu.memory_space<vmem>>, vector<128x10xf32>
    %c0_1 = arith.constant 0 : index
    %c0_2 = arith.constant 0 : index
    %1 = vector.load %arg2[%c0_1, %c0_2] : memref<10x128xf32, #tpu.memory_space<vmem>>, vector<10x128xf32>
    %cst = arith.constant dense<0.000000e+00> : vector<128x128xf32>
    %2 = tpu.matmul %0, %1, %cst {dimension_numbers = #tpu.dot_dimension_numbers<[1], [0], [0], [1], [0, 0, 1, 1], [], []>} : vector<128x10xf32>, vector<10x128xf32>, vector<128x128xf32> -> vector<128x128xf32>
    %c0_3 = arith.constant 0 : index
    %c0_4 = arith.constant 0 : index
    %3 = vector.load %arg3[%c0_3, %c0_4] : memref<1x128xf32, #tpu.memory_space<vmem>>, vector<1x128xf32>
    %4 = vector.broadcast %3 : vector<1x128xf32> to vector<128x128xf32>
    %5 = arith.addf %2, %4 : vector<128x128xf32>
    %cst_5 = arith.constant 0.000000e+00 : f32
    %6 = vector.broadcast %cst_5 : f32 to vector<128x128xf32>
    %7 = arith.cmpf ogt, %5, %6 : vector<128x128xf32>
    %cst_6 = arith.constant 2.000000e-01 : f32
    %8 = vector.broadcast %cst_6 : f32 to vector<128x128xf32>
    %9 = arith.mulf %8, %5 : vector<128x128xf32>
    %10 = arith.select %7, %5, %9 : vector<128x128xi1>, vector<128x128xf32>
    %c0_7 = arith.constant 0 : index
    %c0_8 = arith.constant 0 : index
    %11 = vector.load %arg4[%c0_7, %c0_8] : memref<128x128xf32, #tpu.memory_space<vmem>>, vector<128x128xf32>
    %cst_9 = arith.constant dense<0.000000e+00> : vector<128x128xf32>
    %12 = tpu.matmul %10, %11, %cst_9 {dimension_numbers = #tpu.dot_dimension_numbers<[1], [0], [0], [1], [0, 0, 1, 1], [], []>} : vector<128x128xf32>, vector<128x128xf32>, vector<128x128xf32> -> vector<128x128xf32>
    %c0_10 = arith.constant 0 : index
    %c0_11 = arith.constant 0 : index
    %13 = vector.load %arg5[%c0_10, %c0_11] : memref<1x128xf32, #tpu.memory_space<vmem>>, vector<1x128xf32>
    %14 = vector.broadcast %13 : vector<1x128xf32> to vector<128x128xf32>
    %15 = arith.addf %12, %14 : vector<128x128xf32>
    %cst_12 = arith.constant 0.000000e+00 : f32
    %16 = vector.broadcast %cst_12 : f32 to vector<128x128xf32>
    %17 = arith.cmpf ogt, %15, %16 : vector<128x128xf32>
    %cst_13 = arith.constant 2.000000e-01 : f32
    %18 = vector.broadcast %cst_13 : f32 to vector<128x128xf32>
    %19 = arith.mulf %18, %15 : vector<128x128xf32>
    %20 = arith.select %17, %15, %19 : vector<128x128xi1>, vector<128x128xf32>
    %c0_14 = arith.constant 0 : index
    %c0_15 = arith.constant 0 : index
    %21 = vector.load %arg6[%c0_14, %c0_15] : memref<128x128xf32, #tpu.memory_space<vmem>>, vector<128x128xf32>
    %cst_16 = arith.constant dense<0.000000e+00> : vector<128x128xf32>
    %22 = tpu.matmul %20, %21, %cst_16 {dimension_numbers = #tpu.dot_dimension_numbers<[1], [0], [0], [1], [0, 0, 1, 1], [], []>} : vector<128x128xf32>, vector<128x128xf32>, vector<128x128xf32> -> vector<128x128xf32>
    %c0_17 = arith.constant 0 : index
    %c0_18 = arith.constant 0 : index
    %23 = vector.load %arg7[%c0_17, %c0_18] : memref<1x128xf32, #tpu.memory_space<vmem>>, vector<1x128xf32>
    %24 = vector.broadcast %23 : vector<1x128xf32> to vector<128x128xf32>
    %25 = arith.addf %22, %24 : vector<128x128xf32>
    %c0_19 = arith.constant 0 : index
    %c0_20 = arith.constant 0 : index
    %26 = vector.load %arg8[%c0_19, %c0_20] : memref<1x128xf32, #tpu.memory_space<vmem>>, vector<1x128xf32>
    %cst_21 = arith.constant dense<0.000000e+00> : vector<1x128xf32>
    %27 = tpu.matmul %26, %25, %cst_21 {dimension_numbers = #tpu.dot_dimension_numbers<[1], [1], [0], [0], [0, 0, 1, 0], [], []>} : vector<1x128xf32>, vector<128x128xf32>, vector<1x128xf32> -> vector<1x128xf32>
    %c0_22 = arith.constant 0 : index
    %c0_23 = arith.constant 0 : index
    %28 = vector.load %arg9[%c0_22, %c0_23] : memref<1x1xf32, #tpu.memory_space<vmem>>, vector<1x1xf32>
    %29 = vector.broadcast %28 : vector<1x1xf32> to vector<1x128xf32>
    %30 = arith.addf %27, %29 : vector<1x128xf32>
    %cst_24 = arith.constant 0.000000e+00 : f32
    %31 = vector.broadcast %cst_24 : f32 to vector<1x128xf32>
    %32 = arith.subf %31, %30 : vector<1x128xf32>
    %33 = math.exp %32 : vector<1x128xf32>
    %cst_25 = arith.constant 1.000000e+00 : f32
    %34 = vector.broadcast %cst_25 : f32 to vector<1x128xf32>
    %35 = arith.addf %34, %33 : vector<1x128xf32>
    %36 = tpu.reciprocal %35 : vector<1x128xf32> -> vector<1x128xf32>
    %c0_26 = arith.constant 0 : index
    %c0_27 = arith.constant 0 : index
    %37 = vector.load %arg10[%c0_26, %c0_27] : memref<1x128xf32, #tpu.memory_space<vmem>>, vector<1x128xf32>
    tpu.vector_store %arg10[%c0_26, %c0_27], %36 {strides = array<i32>} : memref<1x128xf32, #tpu.memory_space<vmem>>, vector<1x128xf32>,
    return
  }
  func.func @transform_0(%arg0: i32) -> (i32, i32) {
    %c0_i32 = arith.constant 0 : i32
    %c0_i32_0 = arith.constant 0 : i32
    return %arg0, %c0_i32 : i32, i32
  }
  func.func @transform_1(%arg0: i32) -> (i32, i32) {
    %c0_i32 = arith.constant 0 : i32
    %c0_i32_0 = arith.constant 0 : i32
    %c0_i32_1 = arith.constant 0 : i32
    return %c0_i32, %c0_i32_0 : i32, i32
  }
  func.func @transform_2(%arg0: i32) -> (i32, i32) {
    %c0_i32 = arith.constant 0 : i32
    %c0_i32_0 = arith.constant 0 : i32
    %c0_i32_1 = arith.constant 0 : i32
    return %c0_i32, %c0_i32_0 : i32, i32
  }
  func.func @transform_3(%arg0: i32) -> (i32, i32) {
    %c0_i32 = arith.constant 0 : i32
    %c0_i32_0 = arith.constant 0 : i32
    %c0_i32_1 = arith.constant 0 : i32
    return %c0_i32, %c0_i32_0 : i32, i32
  }
  func.func @transform_4(%arg0: i32) -> (i32, i32) {
    %c0_i32 = arith.constant 0 : i32
    %c0_i32_0 = arith.constant 0 : i32
    %c0_i32_1 = arith.constant 0 : i32
    return %c0_i32, %c0_i32_0 : i32, i32
  }
  func.func @transform_5(%arg0: i32) -> (i32, i32) {
    %c0_i32 = arith.constant 0 : i32
    %c0_i32_0 = arith.constant 0 : i32
    %c0_i32_1 = arith.constant 0 : i32
    return %c0_i32, %c0_i32_0 : i32, i32
  }
  func.func @transform_6(%arg0: i32) -> (i32, i32) {
    %c0_i32 = arith.constant 0 : i32
    %c0_i32_0 = arith.constant 0 : i32
    %c0_i32_1 = arith.constant 0 : i32
    return %c0_i32, %c0_i32_0 : i32, i32
  }
  func.func @transform_7(%arg0: i32) -> (i32, i32) {
    %c0_i32 = arith.constant 0 : i32
    %c0_i32_0 = arith.constant 0 : i32
    %c0_i32_1 = arith.constant 0 : i32
    return %c0_i32, %c0_i32_0 : i32, i32
  }
  func.func @transform_8(%arg0: i32) -> (i32, i32) {
    %c0_i32 = arith.constant 0 : i32
    %c0_i32_0 = arith.constant 0 : i32
    %c0_i32_1 = arith.constant 0 : i32
    return %c0_i32, %c0_i32_0 : i32, i32
  }
  func.func @transform_9(%arg0: i32) -> (i32, i32) {
    %c0_i32 = arith.constant 0 : i32
    %c0_i32_0 = arith.constant 0 : i32
    return %c0_i32, %arg0 : i32, i32
  }
}

</mosaic_0001>

<bundles_post_ra>
// kernel: discriminator_rnc_forward.1
= control target key start
LH: loop header
LB: loop body
LE: loop exit
PB: predicated region body
PF: predicated region fallthrough
CT: control target
= control target key end

     0   :  { %s1407_s0 = inlined_call_operand.vmem [shape: f32[128,10], index: 0, kind: input, shape index: {}]   ;;  %s1408_s1 = inlined_call_operand.vmem [shape: f32[10,128], index: 1, kind: input, shape index: {}]   ;;  %s1409_s2 = inlined_call_operand.hbm [shape: f32[1,128], index: 2, kind: input, shape index: {}]   ;;  %s1410_s3 = inlined_call_operand.vmem [shape: f32[128,128], index: 3, kind: input, shape index: {}]   ;;  %s1411_s4 = inlined_call_operand.vmem [shape: f32[1,128], index: 4, kind: input, shape index: {}]   ;;  %s1412_s5 = inlined_call_operand.hbm [shape: f32[128,128], index: 5, kind: input, shape index: {}]   ;;  %s1413_s6 = inlined_call_operand.vmem [shape: f32[1,128], index: 6, kind: input, shape index: {}]   ;;  %s1414_s7 = inlined_call_operand.vmem [shape: f32[1,128], index: 7, kind: input, shape index: {}]   ;;  %s1415_s8 = inlined_call_operand.<no memory space> [shape: f32[1,1], index: 8, kind: input, shape index: {}]   ;;  %s1416_s9 = inlined_call_operand.vmem [shape: f32[1,128], index: 9, kind: output, shape index: {}]  }
   0x1   :  { %v14_v0 = vstv %s1415_s8 }
   0x2   :  { %15 = vst [vmem:[#allocation2] sm:$0x1] %v14_v0 }
   0x3   :  { %16 = vsyncpa [#allocation4], 0 }
   0x4   :  { %17 = vsyncpa [#allocation6], 0  ;;  %s1158_s11 = smov [#allocation3]   ;;  %s1159_s13 = smov [#allocation5]  }
   0x5   :  { %s28_s12 = sshll.u32 %s1158_s11, 4  ;;  %s41_s14 = sshll.u32 %s1159_s13, 4  ;;  %s29_s12 = int_to_ptr.vmem [resolvable:$true] %s28_s12  ;;  %s42_s14 = int_to_ptr.vmem [resolvable:$true] %s41_s14 }
   0x6   :  { %s1122_s15 = scalar_lea.vmem %s29_s12, 16  ;;  %s1126_s16 = scalar_lea.vmem %s29_s12, 32 }
   0x7   :  { %p1123_p0 = scmp.ne.s32.totalorder %s29_s12, %s1122_s15  ;;  %p1127_p1 = scmp.lt.s32.totalorder %s29_s12, %s29_s12 }
   0x8   :  { %p1128_p2 = scmp.lt.s32.totalorder %s1126_s16, %s1122_s15 }
   0xa   :  { %p1129_p3 = por %p1128_p2, %p1127_p1 }
   0xc   :  { %p1130_p4 = pnand %p1129_p3, %p1123_p0 }
   0xe   :  { %1133 = shalt.err (!%p1130_p4)
}
   0xf   :  { %31 = dma.hbm_to_vmem [thread:$0]  %s1409_s2, 16, %s29_s12, [#allocation4]  }
  0x10   :  { %s1142_s8 = scalar_lea.vmem %s42_s14, 2048  ;;  %p1147_p6 = scmp.lt.s32.totalorder %s42_s14, %s42_s14 }
  0x11   :  { %p1143_p5 = scmp.ne.s32.totalorder %s42_s14, %s1142_s8  ;;  %p1148_p7 = scmp.lt.s32.totalorder %s1142_s8, %s1142_s8 }
  0x13   :  { %p1149_p8 = por %p1148_p7, %p1147_p6 }
  0x15   :  { %p1150_p9 = pnand %p1149_p8, %p1143_p5 }
  0x17   :  { %1153 = shalt.err (!%p1150_p9)
}
  0x18   :  { %s1160_s19 = smov 128   ;;  %s1161_s20 = smov 8  }
  0x19   :  { %47 = dma.hbm_to_vmem [thread:$0]  %s1412_s5, 2048, %s42_s14, [#allocation6], %s1160_s19, %s1160_s19, %s1161_s20  }
  0x1a   :  { %1154 = dma.done.wait [#allocation4], 16  }
  0x1b   :  { %1155 = vsyncadd [#allocation4], 4294967280 }
  0x1c   :  { %1156 = dma.done.wait [#allocation6], 2048  }
  0x1d   :  { %1157 = vsyncadd [#allocation6], 4294965248  ;;  %vm134_vm0 = vcmask 1041408   ;;  %vm85_vm1 = vcmask 80896   ;;  %v77_v1 = vld [vmem:[%s1408_s1 + $0x8] sm:$0x3] }
  0x1e   :  { %v76_v2 = vld [vmem:[%s1408_s1] sm:$0xff]  ;;  %927 = vmatprep.subr.msk.mxu0 %vm134_vm0, %v77_v1  ;;  %v61_v4 = vld [vmem:[%s1407_s0 + $0x8] sm:$0xff]  ;;  %v62_v5 = vld [vmem:[%s1407_s0 + $0x10] sm:$0xff] }
  0x1f   :  { %v60_v3 = vld [vmem:[%s1407_s0] sm:$0xff]  ;;  %928 = vmatpush3.msk.msra.mxu0 %vm134_vm0, %v77_v1  ;;  %v63_v6 = vld [vmem:[%s1407_s0 + $0x18] sm:$0xff]  ;;  %v345_v8 = vld [vmem:[%s1410_s3 + $0x70] sm:$0xff] }
  0x20   :  { %931 = vmatprep.mubr.msk.f32.mxu0 %vm85_vm1, %v60_v3  ;;  %929 = vmatprep.subr.mxu0 %v76_v2  ;;  %v346_v7 = vld [vmem:[%s1410_s3 + $0x78] sm:$0xff]  ;;  %v64_v9 = vld [vmem:[%s1407_s0 + $0x20] sm:$0xff]  ;;  %v344_v10 = vld [vmem:[%s1410_s3 + $0x68] sm:$0xff] }
  0x21   :  { %930 = vmatpush3.msra.mxu0 %v76_v2  ;;  %955 = vmatprep.subr.mxu1 %v346_v7  ;;  %v65_v11 = vld [vmem:[%s1407_s0 + $0x28] sm:$0xff]  ;;  %v343_v12 = vld [vmem:[%s1410_s3 + $0x60] sm:$0xff]  ;;  %v66_v13 = vld [vmem:[%s1407_s0 + $0x30] sm:$0xff] }
  0x22   :  { %932 = vmatmul.mubr.msk.f32.vlgmr.msra.gmra.mxu0 %vm85_vm1, %v61_v4  ;;  %956 = vmatpush3.msra.mxu1 %v346_v7  ;;  %v342_v14 = vld [vmem:[%s1410_s3 + $0x58] sm:$0xff]  ;;  %v341_v16 = vld [vmem:[%s1410_s3 + $0x50] sm:$0xff]  ;;  %v68_v17 = vld [vmem:[%s1407_s0 + $0x40] sm:$0xff] }
  0x23   :  { %934 = vmatprep.mubr.msk.f32.mxu0 %vm85_vm1, %v62_v5  ;;  %957 = vmatprep.subr.mxu1 %v345_v8  ;;  %v67_v15 = vld [vmem:[%s1407_s0 + $0x38] sm:$0xff]  ;;  %v340_v18 = vld [vmem:[%s1410_s3 + $0x48] sm:$0xff]  ;;  %v339_v20 = vld [vmem:[%s1410_s3 + $0x40] sm:$0xff] }
  0x24   :  { %958 = vmatpush3.msra.mxu1 %v345_v8  ;;  %v69_v19 = vld [vmem:[%s1407_s0 + $0x48] sm:$0xff]  ;;  %v70_v21 = vld [vmem:[%s1407_s0 + $0x50] sm:$0xff]  ;;  %v338_v22 = vld [vmem:[%s1410_s3 + $0x38] sm:$0xff] }
  0x25   :  { %959 = vmatprep.subr.mxu1 %v344_v10  ;;  %v71_v23 = vld [vmem:[%s1407_s0 + $0x58] sm:$0xff]  ;;  %v337_v24 = vld [vmem:[%s1410_s3 + $0x30] sm:$0xff]  ;;  %v72_v25 = vld [vmem:[%s1407_s0 + $0x60] sm:$0xff] }
  0x26   :  { %935 = vmatmul.mubr.msk.f32.gmra.mxu0 %vm85_vm1, %v63_v6  ;;  %960 = vmatpush3.msra.mxu1 %v344_v10  ;;  %v336_v26 = vld [vmem:[%s1410_s3 + $0x28] sm:$0xff]  ;;  %v335_v28 = vld [vmem:[%s1410_s3 + $0x20] sm:$0xff]  ;;  %v74_v29 = vld [vmem:[%s1407_s0 + $0x70] sm:$0xff] }
  0x27   :  { %937 = vmatprep.mubr.msk.f32.mxu0 %vm85_vm1, %v64_v9  ;;  %961 = vmatprep.subr.mxu1 %v343_v12  ;;  %v73_v27 = vld [vmem:[%s1407_s0 + $0x68] sm:$0xff]  ;;  %v75_v30 = vld [vmem:[%s1407_s0 + $0x78] sm:$0xff]  ;;  %v333_v32 = vld [vmem:[%s1410_s3 + $0x10] sm:$0xff] }
  0x28   :  { %962 = vmatpush3.msra.mxu1 %v343_v12  ;;  %v334_v31 = vld [vmem:[%s1410_s3 + $0x18] sm:$0xff]  ;;  %v332_v33 = vld [vmem:[%s1410_s3 + $0x8] sm:$0xff]  ;;  %v331_v34 = vld [vmem:[%s1410_s3] sm:$0xff] }
  0x29   :  { %963 = vmatprep.subr.mxu1 %v342_v14  ;;  %v562_v35 = vld [vmem:[#allocation5 + $0x78] sm:$0xff]  ;;  %v561_v36 = vld [vmem:[#allocation5 + $0x70] sm:$0xff]  ;;  %v560_v37 = vld [vmem:[#allocation5 + $0x68] sm:$0xff] }
  0x2a   :  { %938 = vmatmul.mubr.msk.f32.gmra.mxu0 %vm85_vm1, %v65_v11  ;;  %964 = vmatpush3.msra.mxu1 %v342_v14  ;;  %v559_v38 = vld [vmem:[#allocation5 + $0x60] sm:$0xff]  ;;  %v558_v39 = vld [vmem:[#allocation5 + $0x58] sm:$0xff]  ;;  %v557_v40 = vld [vmem:[#allocation5 + $0x50] sm:$0xff] }
  0x2b   :  { %940 = vmatprep.mubr.msk.f32.mxu0 %vm85_vm1, %v66_v13  ;;  %965 = vmatprep.subr.mxu1 %v341_v16  ;;  %v556_v41 = vld [vmem:[#allocation5 + $0x48] sm:$0xff]  ;;  %v555_v42 = vld [vmem:[#allocation5 + $0x40] sm:$0xff]  ;;  %v554_v43 = vld [vmem:[#allocation5 + $0x38] sm:$0xff] }
  0x2c   :  { %966 = vmatpush3.msra.mxu1 %v341_v16  ;;  %1011 = vmatprep.subr.mxu0 %v562_v35  ;;  %v553_v44 = vld [vmem:[#allocation5 + $0x30] sm:$0xff]  ;;  %v552_v45 = vld [vmem:[#allocation5 + $0x28] sm:$0xff]  ;;  %v551_v46 = vld [vmem:[#allocation5 + $0x20] sm:$0xff] }
  0x2d   :  { %967 = vmatprep.subr.mxu1 %v340_v18  ;;  %1012 = vmatpush3.msra.mxu0 %v562_v35  ;;  %v1342_v47 = vld [vmem:[#allocation3] ss:$0 sm:$0xff] }
  0x2e   :  { %941 = vmatmul.mubr.msk.f32.gmra.mxu0 %vm85_vm1, %v67_v15  ;;  %968 = vmatpush3.msra.mxu1 %v340_v18 }
  0x2f   :  { %943 = vmatprep.mubr.msk.f32.mxu0 %vm85_vm1, %v68_v17  ;;  %969 = vmatprep.subr.mxu1 %v339_v20 }
  0x30   :  { %970 = vmatpush3.msra.mxu1 %v339_v20  ;;  %1013 = vmatprep.subr.mxu0 %v561_v36 }
  0x31   :  { %971 = vmatprep.subr.mxu1 %v338_v22  ;;  %1014 = vmatpush3.msra.mxu0 %v561_v36 }
  0x32   :  { %944 = vmatmul.mubr.msk.f32.gmra.mxu0 %vm85_vm1, %v69_v19  ;;  %972 = vmatpush3.msra.mxu1 %v338_v22 }
  0x33   :  { %946 = vmatprep.mubr.msk.f32.mxu0 %vm85_vm1, %v70_v21  ;;  %973 = vmatprep.subr.mxu1 %v337_v24 }
  0x34   :  { %974 = vmatpush3.msra.mxu1 %v337_v24  ;;  %1015 = vmatprep.subr.mxu0 %v560_v37 }
  0x35   :  { %975 = vmatprep.subr.mxu1 %v336_v26  ;;  %1016 = vmatpush3.msra.mxu0 %v560_v37 }
  0x36   :  { %947 = vmatmul.mubr.msk.f32.gmra.mxu0 %vm85_vm1, %v71_v23  ;;  %976 = vmatpush3.msra.mxu1 %v336_v26 }
  0x37   :  { %949 = vmatprep.mubr.msk.f32.mxu0 %vm85_vm1, %v72_v25  ;;  %977 = vmatprep.subr.mxu1 %v335_v28 }
  0x38   :  { %978 = vmatpush3.msra.mxu1 %v335_v28  ;;  %1017 = vmatprep.subr.mxu0 %v559_v38 }
  0x39   :  { %979 = vmatprep.subr.mxu1 %v334_v31  ;;  %1018 = vmatpush3.msra.mxu0 %v559_v38 }
  0x3a   :  { %950 = vmatmul.mubr.msk.f32.gmra.mxu0 %vm85_vm1, %v73_v27  ;;  %980 = vmatpush3.msra.mxu1 %v334_v31 }
  0x3b   :  { %952 = vmatprep.mubr.msk.f32.mxu0 %vm85_vm1, %v74_v29  ;;  %981 = vmatprep.subr.mxu1 %v333_v32 }
  0x3c   :  { %982 = vmatpush3.msra.mxu1 %v333_v32  ;;  %1019 = vmatprep.subr.mxu0 %v558_v39 }
  0x3d   :  { %983 = vmatprep.subr.mxu1 %v332_v33  ;;  %1020 = vmatpush3.msra.mxu0 %v558_v39 }
  0x3e   :  { %953 = vmatmul.mubr.msk.f32.gmra.mxu0 %vm85_vm1, %v75_v30  ;;  %984 = vmatpush3.msra.mxu1 %v332_v33 }
  0x3f   :  { %985 = vmatprep.subr.mxu1 %v331_v34  ;;  %1021 = vmatprep.subr.mxu0 %v557_v40 }
  0x40   :  { %986 = vmatpush3.msra.mxu1 %v331_v34  ;;  %1022 = vmatpush3.msra.mxu0 %v557_v40 }
  0x41   :  { %1023 = vmatprep.subr.mxu0 %v556_v41 }
  0x42   :  { %1024 = vmatpush3.msra.mxu0 %v556_v41 }
  0x43   :  { %1025 = vmatprep.subr.mxu0 %v555_v42 }
  0x44   :  { %1026 = vmatpush3.msra.mxu0 %v555_v42 }
  0x45   :  { %1027 = vmatprep.subr.mxu0 %v554_v43 }
  0x46   :  { %1028 = vmatpush3.msra.mxu0 %v554_v43 }
  0x47   :  { %1029 = vmatprep.subr.mxu0 %v553_v44 }
  0x48   :  { %1030 = vmatpush3.msra.mxu0 %v553_v44 }
  0x49   :  { %1031 = vmatprep.subr.mxu0 %v552_v45 }
  0x4a   :  { %1032 = vmatpush3.msra.mxu0 %v552_v45 }
  0x4b   :  { %1033 = vmatprep.subr.mxu0 %v551_v46 }
  0x4c   :  { %1034 = vmatpush3.msra.mxu0 %v551_v46 }
  0xe2   :  { %v933_v48 = vpop.f32.mrf.mxu0 }
  0xe3   :  { %v210_v49 = vadd.f32 %v933_v48, %v1342_v47 }
  0xe4   :  { %v204_v50 = vpop.f32.mrf.mxu0 }
  0xe5   :  { %v205_v51 = vadd.f32 %v1342_v47, %v204_v50  ;;  %v300_v52 = vmul.f32 0.2, %v210_v49  ;;  %vm284_vm3 = vcmp.gt.f32.partialorder %v210_v49, 0.0  ;;  %v549_v50 = vld [vmem:[#allocation5 + $0x10] sm:$0xff] }
  0xe6   :  { %v936_v53 = vpop.f32.mrf.mxu0 }
  0xe7   :  { %v220_v54 = vadd.f32 %v936_v53, %v1342_v47  ;;  %vm283_vm2 = vcmp.gt.f32.partialorder %v205_v51, 0.0  ;;  %v299_v55 = vmul.f32 0.2, %v205_v51  ;;  %v316_v61 = vsel %vm284_vm3, %v210_v49, %v300_v52  ;;  %v550_v49 = vld [vmem:[#allocation5 + $0x18] sm:$0xff] }
  0xe8   :  { %v214_v56 = vpop.f32.mrf.mxu0  ;;  %1035 = vmatprep.subr.mxu0 %v550_v49  ;;  %v1363_v52 = vld [vmem:[%s1411_s4] ss:$0 sm:$0xff] }
  0xe9   :  { %v215_v57 = vadd.f32 %v1342_v47, %v214_v56  ;;  %v315_v58 = vsel %vm283_vm2, %v205_v51, %v299_v55  ;;  %v302_v59 = vmul.f32 0.2, %v220_v54  ;;  %vm286_vm5 = vcmp.gt.f32.partialorder %v220_v54, 0.0  ;;  %1036 = vmatpush3.msra.mxu0 %v550_v49  ;;  %v548_v51 = vld [vmem:[#allocation5 + $0x8] sm:$0xff] }
  0xea   :  { %v939_v60 = vpop.f32.mrf.mxu0  ;;  %987 = vmatprep.mubr.f32.mxu1 %v315_v58  ;;  %1037 = vmatprep.subr.mxu0 %v549_v50 }
  0xeb   :  { %v301_v62 = vmul.f32 0.2, %v215_v57  ;;  %v230_v63 = vadd.f32 %v939_v60, %v1342_v47  ;;  %988 = vmatmul.mubr.f32.vlgmr.msra.gmra.mxu1 %v316_v61  ;;  %vm285_vm4 = vcmp.gt.f32.partialorder %v215_v57, 0.0  ;;  %v318_v5 = vsel %vm286_vm5, %v220_v54, %v302_v59  ;;  %1038 = vmatpush3.msra.mxu0 %v549_v50 }
  0xec   :  { %v224_v0 = vpop.f32.mrf.mxu0  ;;  %1039 = vmatprep.subr.mxu0 %v548_v51 }
  0xed   :  { %v225_v1 = vadd.f32 %v1342_v47, %v224_v0  ;;  %v317_v2 = vsel %vm285_vm4, %v215_v57, %v301_v62  ;;  %v304_v3 = vmul.f32 0.2, %v230_v63  ;;  %vm288_vm7 = vcmp.gt.f32.partialorder %v230_v63, 0.0  ;;  %1040 = vmatpush3.msra.mxu0 %v548_v51 }
  0xee   :  { %v942_v4 = vpop.f32.mrf.mxu0  ;;  %990 = vmatprep.mubr.f32.mxu1 %v317_v2 }
  0xef   :  { %v303_v6 = vmul.f32 0.2, %v225_v1  ;;  %v240_v7 = vadd.f32 %v942_v4, %v1342_v47  ;;  %991 = vmatmul.mubr.f32.gmra.mxu1 %v318_v5  ;;  %vm287_vm6 = vcmp.gt.f32.partialorder %v225_v1, 0.0  ;;  %v320_v13 = vsel %vm288_vm7, %v230_v63, %v304_v3 }
  0xf0   :  { %v234_v8 = vpop.f32.mrf.mxu0 }
  0xf1   :  { %v235_v9 = vadd.f32 %v1342_v47, %v234_v8  ;;  %v319_v10 = vsel %vm287_vm6, %v225_v1, %v303_v6  ;;  %v306_v11 = vmul.f32 0.2, %v240_v7  ;;  %vm290_vm9 = vcmp.gt.f32.partialorder %v240_v7, 0.0 }
  0xf2   :  { %v945_v12 = vpop.f32.mrf.mxu0  ;;  %993 = vmatprep.mubr.f32.mxu1 %v319_v10 }
  0xf3   :  { %v305_v14 = vmul.f32 0.2, %v235_v9  ;;  %v250_v15 = vadd.f32 %v945_v12, %v1342_v47  ;;  %994 = vmatmul.mubr.f32.gmra.mxu1 %v320_v13  ;;  %vm289_vm8 = vcmp.gt.f32.partialorder %v235_v9, 0.0  ;;  %v322_v21 = vsel %vm290_vm9, %v240_v7, %v306_v11 }
  0xf4   :  { %v244_v16 = vpop.f32.mrf.mxu0 }
  0xf5   :  { %v245_v17 = vadd.f32 %v1342_v47, %v244_v16  ;;  %v321_v18 = vsel %vm289_vm8, %v235_v9, %v305_v14  ;;  %v308_v19 = vmul.f32 0.2, %v250_v15  ;;  %vm292_vm11 = vcmp.gt.f32.partialorder %v250_v15, 0.0 }
  0xf6   :  { %v948_v20 = vpop.f32.mrf.mxu0  ;;  %996 = vmatprep.mubr.f32.mxu1 %v321_v18 }
  0xf7   :  { %v307_v22 = vmul.f32 0.2, %v245_v17  ;;  %v260_v23 = vadd.f32 %v948_v20, %v1342_v47  ;;  %997 = vmatmul.mubr.f32.gmra.mxu1 %v322_v21  ;;  %vm291_vm10 = vcmp.gt.f32.partialorder %v245_v17, 0.0  ;;  %v324_v29 = vsel %vm292_vm11, %v250_v15, %v308_v19 }
  0xf8   :  { %v254_v24 = vpop.f32.mrf.mxu0 }
  0xf9   :  { %v255_v25 = vadd.f32 %v1342_v47, %v254_v24  ;;  %v323_v26 = vsel %vm291_vm10, %v245_v17, %v307_v22  ;;  %v310_v27 = vmul.f32 0.2, %v260_v23  ;;  %vm294_vm13 = vcmp.gt.f32.partialorder %v260_v23, 0.0 }
  0xfa   :  { %v951_v28 = vpop.f32.mrf.mxu0  ;;  %999 = vmatprep.mubr.f32.mxu1 %v323_v26 }
  0xfb   :  { %v309_v30 = vmul.f32 0.2, %v255_v25  ;;  %v270_v31 = vadd.f32 %v951_v28, %v1342_v47  ;;  %1000 = vmatmul.mubr.f32.gmra.mxu1 %v324_v29  ;;  %vm293_vm12 = vcmp.gt.f32.partialorder %v255_v25, 0.0  ;;  %v326_v37 = vsel %vm294_vm13, %v260_v23, %v310_v27 }
  0xfc   :  { %v264_v32 = vpop.f32.mrf.mxu0 }
  0xfd   :  { %v265_v33 = vadd.f32 %v1342_v47, %v264_v32  ;;  %v325_v34 = vsel %vm293_vm12, %v255_v25, %v309_v30  ;;  %v312_v35 = vmul.f32 0.2, %v270_v31  ;;  %vm296_vm15 = vcmp.gt.f32.partialorder %v270_v31, 0.0 }
  0xfe   :  { %v954_v36 = vpop.f32.mrf.mxu0  ;;  %1002 = vmatprep.mubr.f32.mxu1 %v325_v34 }
  0xff   :  { %v311_v38 = vmul.f32 0.2, %v265_v33  ;;  %v280_v39 = vadd.f32 %v954_v36, %v1342_v47  ;;  %1003 = vmatmul.mubr.f32.gmra.mxu1 %v326_v37  ;;  %vm295_vm14 = vcmp.gt.f32.partialorder %v265_v33, 0.0  ;;  %v328_v44 = vsel %vm296_vm15, %v270_v31, %v312_v35 }
 0x100   :  { %v274_v40 = vpop.f32.mrf.mxu0 }
 0x101   :  { %v275_v41 = vadd.f32 %v1342_v47, %v274_v40  ;;  %v327_v42 = vsel %vm295_vm14, %v265_v33, %v311_v38  ;;  %v314_v43 = vmul.f32 0.2, %v280_v39  ;;  %vm298_vm1 = vcmp.gt.f32.partialorder %v280_v39, 0.0  ;;  %v547_v47 = vld [vmem:[#allocation5] sm:$0xff] }
 0x102   :  { %1005 = vmatprep.mubr.f32.mxu1 %v327_v42  ;;  %1041 = vmatprep.subr.mxu0 %v547_v47 }
 0x103   :  { %v313_v45 = vmul.f32 0.2, %v275_v41  ;;  %1006 = vmatmul.mubr.f32.gmra.mxu1 %v328_v44  ;;  %vm297_vm0 = vcmp.gt.f32.partialorder %v275_v41, 0.0  ;;  %v330_v48 = vsel %vm298_vm1, %v280_v39, %v314_v43  ;;  %1042 = vmatpush3.msra.mxu0 %v547_v47 }
 0x105   :  { %v329_v46 = vsel %vm297_vm0, %v275_v41, %v313_v45 }
 0x106   :  { %1008 = vmatprep.mubr.f32.mxu1 %v329_v46 }
 0x107   :  { %1009 = vmatmul.mubr.f32.gmra.mxu1 %v330_v48 }
 0x1ab   :  { %v989_v53 = vpop.f32.mrf.mxu1 }
 0x1ac   :  { %v426_v54 = vadd.f32 %v989_v53, %v1363_v52 }
 0x1ad   :  { %v420_v55 = vpop.f32.mrf.mxu1 }
 0x1ae   :  { %v421_v56 = vadd.f32 %v1363_v52, %v420_v55  ;;  %v516_v57 = vmul.f32 0.2, %v426_v54  ;;  %vm500_vm2 = vcmp.gt.f32.partialorder %v426_v54, 0.0  ;;  %v716_v55 = vld [vmem:[#allocation2] sm:$0x1] }
 0x1af   :  { %v992_v58 = vpop.f32.mrf.mxu1 }
 0x1b0   :  { %v515_v59 = vmul.f32 0.2, %v421_v56  ;;  %v436_v60 = vadd.f32 %v992_v58, %v1363_v52  ;;  %vm499_vm3 = vcmp.gt.f32.partialorder %v421_v56, 0.0  ;;  %v532_v0 = vsel %vm500_vm2, %v426_v54, %v516_v57 }
 0x1b1   :  { %v430_v61 = vpop.f32.mrf.mxu1  ;;  %v1162_v54 = vmov 0.0   ;;  %vm1163_vm2 = vmmov 0  }
 0x1b2   :  { %v431_v62 = vadd.f32 %v1363_v52, %v430_v61  ;;  %v531_v63 = vsel %vm499_vm3, %v421_v56, %v515_v59  ;;  %v518_v1 = vmul.f32 0.2, %v436_v60  ;;  %vm502_vm5 = vcmp.gt.f32.partialorder %v436_v60, 0.0  ;;  %1067 = vmatprep.subr.mxu1 %v1162_v54  ;;  %1099 = vmatprep.mubr.msk.f32.mxu1 %vm1163_vm2, %v1162_v54 }
 0x1b3   :  { %v995_v2 = vpop.f32.mrf.mxu1  ;;  %1043 = vmatprep.mubr.f32.mxu0 %v531_v63 }
 0x1b4   :  { %v517_v3 = vmul.f32 0.2, %v431_v62  ;;  %v446_v4 = vadd.f32 %v995_v2, %v1363_v52  ;;  %1044 = vmatmul.mubr.f32.vlgmr.msra.gmra.mxu0 %v532_v0  ;;  %vm501_vm4 = vcmp.gt.f32.partialorder %v431_v62, 0.0  ;;  %v534_v10 = vsel %vm502_vm5, %v436_v60, %v518_v1 }
 0x1b5   :  { %v440_v5 = vpop.f32.mrf.mxu1 }
 0x1b6   :  { %v441_v6 = vadd.f32 %v1363_v52, %v440_v5  ;;  %v533_v7 = vsel %vm501_vm4, %v431_v62, %v517_v3  ;;  %v520_v8 = vmul.f32 0.2, %v446_v4  ;;  %vm504_vm7 = vcmp.gt.f32.partialorder %v446_v4, 0.0 }
 0x1b7   :  { %v998_v9 = vpop.f32.mrf.mxu1  ;;  %1046 = vmatprep.mubr.f32.mxu0 %v533_v7 }
 0x1b8   :  { %v519_v11 = vmul.f32 0.2, %v441_v6  ;;  %v456_v12 = vadd.f32 %v998_v9, %v1363_v52  ;;  %1047 = vmatmul.mubr.f32.gmra.mxu0 %v534_v10  ;;  %vm503_vm6 = vcmp.gt.f32.partialorder %v441_v6, 0.0  ;;  %v536_v18 = vsel %vm504_vm7, %v446_v4, %v520_v8 }
 0x1b9   :  { %v450_v13 = vpop.f32.mrf.mxu1 }
 0x1ba   :  { %v451_v14 = vadd.f32 %v1363_v52, %v450_v13  ;;  %v535_v15 = vsel %vm503_vm6, %v441_v6, %v519_v11  ;;  %v522_v16 = vmul.f32 0.2, %v456_v12  ;;  %vm506_vm9 = vcmp.gt.f32.partialorder %v456_v12, 0.0  ;;  %v827_v6 = vld [vmem:[%s1413_s6] ss:$0 sm:$0xff] }
 0x1bb   :  { %v1001_v17 = vpop.f32.mrf.mxu1  ;;  %1049 = vmatprep.mubr.f32.mxu0 %v535_v15 }
 0x1bc   :  { %v521_v19 = vmul.f32 0.2, %v451_v14  ;;  %v466_v20 = vadd.f32 %v1001_v17, %v1363_v52  ;;  %1050 = vmatmul.mubr.f32.gmra.mxu0 %v536_v18  ;;  %vm505_vm8 = vcmp.gt.f32.partialorder %v451_v14, 0.0  ;;  %v538_v26 = vsel %vm506_vm9, %v456_v12, %v522_v16 }
 0x1bd   :  { %v460_v21 = vpop.f32.mrf.mxu1 }
 0x1be   :  { %v461_v22 = vadd.f32 %v1363_v52, %v460_v21  ;;  %v537_v23 = vsel %vm505_vm8, %v451_v14, %v521_v19  ;;  %v524_v24 = vmul.f32 0.2, %v466_v20  ;;  %vm508_vm11 = vcmp.gt.f32.partialorder %v466_v20, 0.0 }
 0x1bf   :  { %v1004_v25 = vpop.f32.mrf.mxu1  ;;  %1052 = vmatprep.mubr.f32.mxu0 %v537_v23 }
 0x1c0   :  { %v523_v27 = vmul.f32 0.2, %v461_v22  ;;  %v476_v28 = vadd.f32 %v1004_v25, %v1363_v52  ;;  %1053 = vmatmul.mubr.f32.gmra.mxu0 %v538_v26  ;;  %vm507_vm10 = vcmp.gt.f32.partialorder %v461_v22, 0.0  ;;  %v540_v34 = vsel %vm508_vm11, %v466_v20, %v524_v24  ;;  %v715_v25 = vld [vmem:[%s1414_s7] sm:$0x1] }
 0x1c1   :  { %v470_v29 = vpop.f32.mrf.mxu1  ;;  %v722_v26 = vlaneseq }
 0x1c2   :  { %v471_v30 = vadd.f32 %v1363_v52, %v470_v29  ;;  %v539_v31 = vsel %vm507_vm10, %v461_v22, %v523_v27  ;;  %v526_v32 = vmul.f32 0.2, %v476_v28  ;;  %vm510_vm13 = vcmp.gt.f32.partialorder %v476_v28, 0.0 }
 0x1c3   :  { %v1007_v33 = vpop.f32.mrf.mxu1  ;;  %1055 = vmatprep.mubr.f32.mxu0 %v539_v31  ;;  %v723_v27 = vshrl.u32 %v722_v26, 7 }
 0x1c4   :  { %v525_v35 = vmul.f32 0.2, %v471_v30  ;;  %v486_v36 = vadd.f32 %v1007_v33, %v1363_v52  ;;  %1056 = vmatmul.mubr.f32.gmra.mxu0 %v540_v34  ;;  %vm509_vm12 = vcmp.gt.f32.partialorder %v471_v30, 0.0  ;;  %v542_v42 = vsel %vm510_vm13, %v476_v28, %v526_v32 }
 0x1c5   :  { %v480_v37 = vpop.f32.mrf.mxu1  ;;  %v724_v28 = vsub.s32 0, %v723_v27 }
 0x1c6   :  { %v481_v38 = vadd.f32 %v1363_v52, %v480_v37  ;;  %v541_v39 = vsel %vm509_vm12, %v471_v30, %v525_v35  ;;  %v528_v40 = vmul.f32 0.2, %v486_v36  ;;  %vm512_vm15 = vcmp.gt.f32.partialorder %v486_v36, 0.0 }
 0x1c7   :  { %v1010_v41 = vpop.f32.mrf.mxu1  ;;  %1058 = vmatprep.mubr.f32.mxu0 %v541_v39 }
 0x1c8   :  { %v527_v43 = vmul.f32 0.2, %v481_v38  ;;  %v496_v44 = vadd.f32 %v1010_v41, %v1363_v52  ;;  %1059 = vmatmul.mubr.f32.gmra.mxu0 %v542_v42  ;;  %vm511_vm14 = vcmp.gt.f32.partialorder %v481_v38, 0.0  ;;  %v544_v50 = vsel %vm512_vm15, %v486_v36, %v528_v40 }
 0x1c9   :  { %v490_v45 = vpop.f32.mrf.mxu1 }
 0x1ca   :  { %v491_v46 = vadd.f32 %v1363_v52, %v490_v45  ;;  %v543_v48 = vsel %vm511_vm14, %v481_v38, %v527_v43  ;;  %v530_v49 = vmul.f32 0.2, %v496_v44  ;;  %vm514_vm1 = vcmp.gt.f32.partialorder %v496_v44, 0.0 }
 0x1cb   :  { %1061 = vmatprep.mubr.f32.mxu0 %v543_v48  ;;  %v1164_v52 = vmov 0  }
 0x1cc   :  { %v529_v51 = vmul.f32 0.2, %v491_v46  ;;  %1062 = vmatmul.mubr.f32.gmra.mxu0 %v544_v50  ;;  %vm513_vm0 = vcmp.gt.f32.partialorder %v491_v46, 0.0  ;;  %v546_v53 = vsel %vm514_vm1, %v496_v44, %v530_v49  ;;  %1109 = vset.pattern.permute.xlu0 %v1164_v52 }
 0x1cd   :  { %719 = vperm.xlu0 %1109, %v716_v55  }
 0x1ce   :  { %v545_v47 = vsel %vm513_vm0, %v491_v46, %v529_v51 }
 0x1cf   :  { %1064 = vmatprep.mubr.f32.mxu0 %v545_v47 }
 0x1d0   :  { %1065 = vmatmul.mubr.f32.gmra.mxu0 %v546_v53 }
 0x248   :  { %v720_v29 = vpop.permute.xlu0 %719 }
 0x249   :  { %v725_v30 = vrot.slane %v720_v29, %v724_v28 }
 0x274   :  { %v1045_v56 = vpop.f32.mrf.mxu0 }
 0x275   :  { %v642_v23 = vadd.f32 %v1045_v56, %v827_v6 }
 0x276   :  { %v636_v57 = vpop.f32.mrf.mxu0 }
 0x277   :  { %v637_v24 = vadd.f32 %v827_v6, %v636_v57 }
 0x278   :  { %v1048_v58 = vpop.f32.mrf.mxu0 }
 0x279   :  { %v652_v21 = vadd.f32 %v1048_v58, %v827_v6 }
 0x27a   :  { %v646_v59 = vpop.f32.mrf.mxu0 }
 0x27b   :  { %v647_v22 = vadd.f32 %v827_v6, %v646_v59 }
 0x27c   :  { %v1051_v60 = vpop.f32.mrf.mxu0 }
 0x27d   :  { %v662_v19 = vadd.f32 %v1051_v60, %v827_v6 }
 0x27e   :  { %v656_v61 = vpop.f32.mrf.mxu0 }
 0x27f   :  { %v657_v20 = vadd.f32 %v827_v6, %v656_v61 }
 0x280   :  { %v1054_v62 = vpop.f32.mrf.mxu0 }
 0x281   :  { %v672_v17 = vadd.f32 %v1054_v62, %v827_v6 }
 0x282   :  { %v666_v63 = vpop.f32.mrf.mxu0 }
 0x283   :  { %v667_v18 = vadd.f32 %v827_v6, %v666_v63 }
 0x284   :  { %v1057_v0 = vpop.f32.mrf.mxu0 }
 0x285   :  { %v682_v15 = vadd.f32 %v1057_v0, %v827_v6 }
 0x286   :  { %v676_v1 = vpop.f32.mrf.mxu0 }
 0x287   :  { %v677_v16 = vadd.f32 %v827_v6, %v676_v1 }
 0x288   :  { %v1060_v2 = vpop.f32.mrf.mxu0 }
 0x289   :  { %v692_v13 = vadd.f32 %v1060_v2, %v827_v6 }
 0x28a   :  { %v686_v3 = vpop.f32.mrf.mxu0 }
 0x28b   :  { %v687_v14 = vadd.f32 %v827_v6, %v686_v3 }
 0x28c   :  { %v1063_v4 = vpop.f32.mrf.mxu0 }
 0x28d   :  { %v702_v11 = vadd.f32 %v1063_v4, %v827_v6 }
 0x28e   :  { %v696_v5 = vpop.f32.mrf.mxu0 }
 0x28f   :  { %v697_v12 = vadd.f32 %v827_v6, %v696_v5 }
 0x290   :  { %v1066_v7 = vpop.f32.mrf.mxu0 }
 0x291   :  { %v712_v8 = vadd.f32 %v1066_v7, %v827_v6 }
 0x292   :  { %v706_v9 = vpop.f32.mrf.mxu0 }
 0x293   :  { %1068 = vmatpush3.xpose.msra.mxu1 %v712_v8  ;;  %v707_v10 = vadd.f32 %v827_v6, %v706_v9 }
 0x294   :  { %1069 = vmatprep.subr.mxu1 %v1162_v54 }
 0x297   :  { %1070 = vmatpush3.xpose.msra.mxu1 %v707_v10 }
 0x298   :  { %1071 = vmatprep.subr.mxu1 %v1162_v54 }
 0x29b   :  { %1072 = vmatpush3.xpose.msra.mxu1 %v702_v11 }
 0x29c   :  { %1073 = vmatprep.subr.mxu1 %v1162_v54 }
 0x29f   :  { %1074 = vmatpush3.xpose.msra.mxu1 %v697_v12 }
 0x2a0   :  { %1075 = vmatprep.subr.mxu1 %v1162_v54 }
 0x2a3   :  { %1076 = vmatpush3.xpose.msra.mxu1 %v692_v13 }
 0x2a4   :  { %1077 = vmatprep.subr.mxu1 %v1162_v54 }
 0x2a7   :  { %1078 = vmatpush3.xpose.msra.mxu1 %v687_v14 }
 0x2a8   :  { %1079 = vmatprep.subr.mxu1 %v1162_v54 }
 0x2ab   :  { %1080 = vmatpush3.xpose.msra.mxu1 %v682_v15 }
 0x2ac   :  { %1081 = vmatprep.subr.mxu1 %v1162_v54 }
 0x2af   :  { %1082 = vmatpush3.xpose.msra.mxu1 %v677_v16 }
 0x2b0   :  { %1083 = vmatprep.subr.mxu1 %v1162_v54 }
 0x2b3   :  { %1084 = vmatpush3.xpose.msra.mxu1 %v672_v17 }
 0x2b4   :  { %1085 = vmatprep.subr.mxu1 %v1162_v54 }
 0x2b7   :  { %1086 = vmatpush3.xpose.msra.mxu1 %v667_v18 }
 0x2b8   :  { %1087 = vmatprep.subr.mxu1 %v1162_v54 }
 0x2bb   :  { %1088 = vmatpush3.xpose.msra.mxu1 %v662_v19 }
 0x2bc   :  { %1089 = vmatprep.subr.mxu1 %v1162_v54 }
 0x2bf   :  { %1090 = vmatpush3.xpose.msra.mxu1 %v657_v20 }
 0x2c0   :  { %1091 = vmatprep.subr.mxu1 %v1162_v54 }
 0x2c3   :  { %1092 = vmatpush3.xpose.msra.mxu1 %v652_v21 }
 0x2c4   :  { %1093 = vmatprep.subr.mxu1 %v1162_v54 }
 0x2c7   :  { %1094 = vmatpush3.xpose.msra.mxu1 %v647_v22 }
 0x2c8   :  { %1095 = vmatprep.subr.mxu1 %v1162_v54 }
 0x2cb   :  { %1096 = vmatpush3.xpose.msra.mxu1 %v642_v23 }
 0x2cc   :  { %1097 = vmatprep.subr.mxu1 %v1162_v54 }
 0x2cf   :  { %1098 = vmatpush3.xpose.msra.mxu1 %v637_v24 }
 0x2d2   :  { %1100 = vmatmul.mubr.f32.vlgmr.msra.gmra.mxu1 %v715_v25 }
 0x392   :  { %v792_v31 = vpop.f32.mrf.mxu1 }
 0x393   :  { %v793_v32 = vadd.f32 %v792_v31, %v725_v30 }
 0x394   :  { %v1101_v33 = vpop.f32.mrf.mxu1 }
 0x395   :  { %v796_v34 = vsub.f32 0.0, %v793_v32 }
 0x397   :  { %v797_v35 = vmul.f32 1.442695, %v796_v34 }
 0x399   :  { %1110 = vpow2.f32 %v797_v35 }
 0x3a6   :  { %v1111_v36 = vpop.eup %1110 }
 0x3a7   :  { %v799_v37 = vadd.f32 1.0, %v1111_v36 }
 0x3a9   :  { %1112 = vrcp.f32 %v799_v37 }
 0x3b6   :  { %v1113_v38 = vpop.eup %1112 }
 0x3b7   :  { %801 = vst [vmem:[%s1416_s9] sm:$0x1] %v1113_v38 }
 0x3b8   :  { %806 = vsyncpa [#allocation4], 1 }
 0x3b9   :  { %807 = vsyncpa [#allocation6], 1 }

</bundles_post_ra>
